<compile_context>
chip_gen: v7x
topology: tpu7x:2x2x1
jax: 0.10.0
libtpu: 0.0.40
codegen_flags: <defaults>
</compile_context>

<pallas_src>
import jax
import jax.numpy as jnp
from jax import lax
from jax.experimental import pallas as pl
from jax.experimental.pallas import tpu as pltpu


def _ce2d_kernel(x_ref, t_ref, out_ref):
    # x_ref:   (C, Ht, W) logits tile for sample n, H-rows [h*Ht, (h+1)*Ht)
    # t_ref:   (Ht, W) int32 target tile
    # out_ref: (1, 1) f32 partial sum of -log p[target] over this tile
    t = t_ref[...]                                   # (Ht, W) int32
    C, Ht, W = x_ref.shape

    def body(c, acc):
        # Only one channel slice is live at a time -> low vreg/VMEM pressure.
        xc = x_ref[c].astype(jnp.float32)            # (Ht, W)
        m = jnp.max(xc, axis=-1, keepdims=True)      # (Ht, 1)
        lse = jnp.log(jnp.sum(jnp.exp(xc - m), axis=-1, keepdims=True)) + m
        # Fused gather: contribution of channel c at pixels whose target == c.
        contrib = jnp.where(t == c, xc - lse, 0.0)   # (Ht, W)
        return acc + jnp.sum(contrib, axis=-1, keepdims=True)   # (Ht, 1)

    picked_rows = lax.fori_loop(
        0, C, body, jnp.zeros((Ht, 1), jnp.float32), unroll=True)

    # Partial negative log-likelihood for this (n, h) tile.
    out_ref[...] = -jnp.sum(picked_rows, axis=0, keepdims=True)   # (1, 1)


def _pick_ht(C, H, W, itemsize, target_block_bytes=1 << 20):
    """Largest multiple-of-8 divisor of H keeping the logits tile <= target."""
    candidates = [ht for ht in range(8, H + 1, 8) if H % ht == 0]
    if not candidates:
        # H < 8 or H has no multiple-of-8 divisor: use the full H extent
        # (a block equal to the full dim is always legal).
        return H
    fitting = [ht for ht in candidates if C * ht * W * itemsize <= target_block_bytes]
    return max(fitting) if fitting else min(candidates)


def cross_entropy_loss_2d(inputs, targets):
    """inputs: (N, C, H, W) float, targets: (N, H, W) int32 -> scalar f32 loss.

    Matches the PyTorch module: mean over N*H*W pixels of
    -log_softmax(inputs, dim=-1)[n, targets[n,h,w], h, w].
    """
    N, C, H, W = inputs.shape
    itemsize = jnp.dtype(inputs.dtype).itemsize
    Ht = _pick_ht(C, H, W, itemsize)
    nh = H // Ht

    # NOTE: for tiny shapes (like the test below) the grid is 1-2 steps and the
    # kernel is correctness-only; the tiling pays off at segmentation scale
    # (e.g. C=21, H=W=512 -> ~0.7 MiB tiles streamed at the HBM roofline).
    # If W is not a multiple of 128, lane utilization of the softmax axis is
    # reduced; production shapes should keep W lane-friendly.
    partials = pl.pallas_call(
        _ce2d_kernel,
        out_shape=jax.ShapeDtypeStruct((N, nh, 1, 1), jnp.float32),
        grid_spec=pltpu.PrefetchScalarGridSpec(
            num_scalar_prefetch=0,
            grid=(N, nh),
            in_specs=[
                pl.BlockSpec((pl.Squeezed(), C, Ht, W), lambda n, h: (n, 0, h, 0)),
                pl.BlockSpec((pl.Squeezed(), Ht, W), lambda n, h: (n, h, 0)),
            ],
            out_specs=pl.BlockSpec(
                (pl.Squeezed(), pl.Squeezed(), 1, 1), lambda n, h: (n, h, 0, 0)),
        ),
        compiler_params=pltpu.CompilerParams(
            # Every grid step owns its own output block -> fully parallel
            # (megacore on v6e, 2 TensorCores on v7x).
            dimension_semantics=("parallel", "parallel"),
            # Tiles are ~<=1 MiB double-buffered; 32 MiB leaves plenty of
            # headroom on every generation (incl. v7x's 64 MiB physical VMEM).
            vmem_limit_bytes=32 * 1024 * 1024,
        ),
    )(inputs, targets)

    # size_average=True, weight=None  ->  mean over all N*H*W pixels.
    return jnp.sum(partials) / jnp.float32(N * H * W)


def _reference(inputs, targets):
    lp = jax.nn.log_softmax(inputs.astype(jnp.float32), axis=-1)
    picked = jnp.take_along_axis(
        lp, targets[:, None, :, :].astype(jnp.int32), axis=1)[:, 0]
    return -jnp.mean(picked)


if __name__ == "__main__":
    key = jax.random.PRNGKey(0)
    kx, kt = jax.random.split(key)

    N, C, H, W = 2, 4, 16, 16
    x = jax.random.normal(kx, (N, C, H, W), dtype=jnp.float32)
    t = jax.random.randint(kt, (N, H, W), 0, C, dtype=jnp.int32)

    loss = jax.block_until_ready(cross_entropy_loss_2d(x, t))
    ref = jax.block_until_ready(_reference(x, t))

    assert jnp.allclose(loss, ref, rtol=1e-5, atol=1e-5), (loss, ref)
    print("KERNEL_OK")
</pallas_src>

<mosaic_0001>
module attributes {stable_mosaic.version = 11 : i64} {
  func.func @_ce2d_kernel(%arg0: i32, %arg1: i32, %arg2: memref<1x4x16x16xf32, #tpu.memory_space<vmem>>, %arg3: memref<1x16x16xi32, #tpu.memory_space<vmem>>, %arg4: memref<1x1x1x1xf32, #tpu.memory_space<vmem>>) attributes {dimension_semantics = [#tpu.dimension_semantics<parallel>, #tpu.dimension_semantics<parallel>], iteration_bounds = array<i64: 2, 1>, scalar_prefetch = 0 : i64, scratch_operands = 0 : i64, tpu.core_type = #tpu.core_type<tc>, window_params = [{transform_indices = @transform_0, window_bounds = array<i64: 1, 4, 16, 16>}, {transform_indices = @transform_1, window_bounds = array<i64: 1, 16, 16>}, {transform_indices = @transform_2, window_bounds = array<i64: 1, 1, 1, 1>}]} {
    %c0 = arith.constant 0 : index
    %c0_0 = arith.constant 0 : index
    %c0_1 = arith.constant 0 : index
    %0 = vector.load %arg3[%c0, %c0_0, %c0_1] : memref<1x16x16xi32, #tpu.memory_space<vmem>>, vector<1x16x16xi32>
    %1 = vector.shape_cast %0 : vector<1x16x16xi32> to vector<16x16xi32>
    %cst = arith.constant 0.000000e+00 : f32
    %2 = vector.broadcast %cst : f32 to vector<16x1xf32>
    %c0_i32 = arith.constant 0 : i32
    %c0_2 = arith.constant 0 : index
    %3 = arith.index_cast %c0_i32 : i32 to index
    %c0_3 = arith.constant 0 : index
    %c0_4 = arith.constant 0 : index
    %4 = vector.load %arg2[%c0_2, %3, %c0_3, %c0_4] : memref<1x4x16x16xf32, #tpu.memory_space<vmem>>, vector<1x1x16x16xf32>
    %5 = vector.shape_cast %4 : vector<1x1x16x16xf32> to vector<16x16xf32>
    %cst_5 = arith.constant dense<0xFF800000> : vector<16xf32>
    %6 = vector.multi_reduction <maximumf>, %5, %cst_5 [1] : vector<16x16xf32> to vector<16xf32>
    %7 = vector.shape_cast %6 : vector<16xf32> to vector<16x1xf32>
    %8 = vector.broadcast %7 : vector<16x1xf32> to vector<16x16xf32>
    %9 = arith.subf %5, %8 : vector<16x16xf32>
    %10 = math.exp %9 : vector<16x16xf32>
    %cst_6 = arith.constant dense<0.000000e+00> : vector<16xf32>
    %11 = vector.multi_reduction <add>, %10, %cst_6 [1] : vector<16x16xf32> to vector<16xf32>
    %12 = vector.shape_cast %11 : vector<16xf32> to vector<16x1xf32>
    %13 = math.log %12 : vector<16x1xf32>
    %14 = arith.addf %13, %7 : vector<16x1xf32>
    %15 = vector.broadcast %c0_i32 : i32 to vector<16x16xi32>
    %16 = arith.cmpi eq, %1, %15 : vector<16x16xi32>
    %17 = vector.broadcast %14 : vector<16x1xf32> to vector<16x16xf32>
    %18 = arith.subf %5, %17 : vector<16x16xf32>
    %cst_7 = arith.constant 0.000000e+00 : f32
    %19 = vector.broadcast %cst_7 : f32 to vector<16x16xf32>
    %20 = arith.select %16, %18, %19 : vector<16x16xi1>, vector<16x16xf32>
    %cst_8 = arith.constant dense<0.000000e+00> : vector<16xf32>
    %21 = vector.multi_reduction <add>, %20, %cst_8 [1] : vector<16x16xf32> to vector<16xf32>
    %22 = vector.shape_cast %21 : vector<16xf32> to vector<16x1xf32>
    %23 = arith.addf %2, %22 : vector<16x1xf32>
    %c1_i32 = arith.constant 1 : i32
    %c0_9 = arith.constant 0 : index
    %24 = arith.index_cast %c1_i32 : i32 to index
    %c0_10 = arith.constant 0 : index
    %c0_11 = arith.constant 0 : index
    %25 = vector.load %arg2[%c0_9, %24, %c0_10, %c0_11] : memref<1x4x16x16xf32, #tpu.memory_space<vmem>>, vector<1x1x16x16xf32>
    %26 = vector.shape_cast %25 : vector<1x1x16x16xf32> to vector<16x16xf32>
    %cst_12 = arith.constant dense<0xFF800000> : vector<16xf32>
    %27 = vector.multi_reduction <maximumf>, %26, %cst_12 [1] : vector<16x16xf32> to vector<16xf32>
    %28 = vector.shape_cast %27 : vector<16xf32> to vector<16x1xf32>
    %29 = vector.broadcast %28 : vector<16x1xf32> to vector<16x16xf32>
    %30 = arith.subf %26, %29 : vector<16x16xf32>
    %31 = math.exp %30 : vector<16x16xf32>
    %cst_13 = arith.constant dense<0.000000e+00> : vector<16xf32>
    %32 = vector.multi_reduction <add>, %31, %cst_13 [1] : vector<16x16xf32> to vector<16xf32>
    %33 = vector.shape_cast %32 : vector<16xf32> to vector<16x1xf32>
    %34 = math.log %33 : vector<16x1xf32>
    %35 = arith.addf %34, %28 : vector<16x1xf32>
    %36 = vector.broadcast %c1_i32 : i32 to vector<16x16xi32>
    %37 = arith.cmpi eq, %1, %36 : vector<16x16xi32>
    %38 = vector.broadcast %35 : vector<16x1xf32> to vector<16x16xf32>
    %39 = arith.subf %26, %38 : vector<16x16xf32>
    %cst_14 = arith.constant 0.000000e+00 : f32
    %40 = vector.broadcast %cst_14 : f32 to vector<16x16xf32>
    %41 = arith.select %37, %39, %40 : vector<16x16xi1>, vector<16x16xf32>
    %cst_15 = arith.constant dense<0.000000e+00> : vector<16xf32>
    %42 = vector.multi_reduction <add>, %41, %cst_15 [1] : vector<16x16xf32> to vector<16xf32>
    %43 = vector.shape_cast %42 : vector<16xf32> to vector<16x1xf32>
    %44 = arith.addf %23, %43 : vector<16x1xf32>
    %c2_i32 = arith.constant 2 : i32
    %c0_16 = arith.constant 0 : index
    %45 = arith.index_cast %c2_i32 : i32 to index
    %c0_17 = arith.constant 0 : index
    %c0_18 = arith.constant 0 : index
    %46 = vector.load %arg2[%c0_16, %45, %c0_17, %c0_18] : memref<1x4x16x16xf32, #tpu.memory_space<vmem>>, vector<1x1x16x16xf32>
    %47 = vector.shape_cast %46 : vector<1x1x16x16xf32> to vector<16x16xf32>
    %cst_19 = arith.constant dense<0xFF800000> : vector<16xf32>
    %48 = vector.multi_reduction <maximumf>, %47, %cst_19 [1] : vector<16x16xf32> to vector<16xf32>
    %49 = vector.shape_cast %48 : vector<16xf32> to vector<16x1xf32>
    %50 = vector.broadcast %49 : vector<16x1xf32> to vector<16x16xf32>
    %51 = arith.subf %47, %50 : vector<16x16xf32>
    %52 = math.exp %51 : vector<16x16xf32>
    %cst_20 = arith.constant dense<0.000000e+00> : vector<16xf32>
    %53 = vector.multi_reduction <add>, %52, %cst_20 [1] : vector<16x16xf32> to vector<16xf32>
    %54 = vector.shape_cast %53 : vector<16xf32> to vector<16x1xf32>
    %55 = math.log %54 : vector<16x1xf32>
    %56 = arith.addf %55, %49 : vector<16x1xf32>
    %57 = vector.broadcast %c2_i32 : i32 to vector<16x16xi32>
    %58 = arith.cmpi eq, %1, %57 : vector<16x16xi32>
    %59 = vector.broadcast %56 : vector<16x1xf32> to vector<16x16xf32>
    %60 = arith.subf %47, %59 : vector<16x16xf32>
    %cst_21 = arith.constant 0.000000e+00 : f32
    %61 = vector.broadcast %cst_21 : f32 to vector<16x16xf32>
    %62 = arith.select %58, %60, %61 : vector<16x16xi1>, vector<16x16xf32>
    %cst_22 = arith.constant dense<0.000000e+00> : vector<16xf32>
    %63 = vector.multi_reduction <add>, %62, %cst_22 [1] : vector<16x16xf32> to vector<16xf32>
    %64 = vector.shape_cast %63 : vector<16xf32> to vector<16x1xf32>
    %65 = arith.addf %44, %64 : vector<16x1xf32>
    %c3_i32 = arith.constant 3 : i32
    %c0_23 = arith.constant 0 : index
    %66 = arith.index_cast %c3_i32 : i32 to index
    %c0_24 = arith.constant 0 : index
    %c0_25 = arith.constant 0 : index
    %67 = vector.load %arg2[%c0_23, %66, %c0_24, %c0_25] : memref<1x4x16x16xf32, #tpu.memory_space<vmem>>, vector<1x1x16x16xf32>
    %68 = vector.shape_cast %67 : vector<1x1x16x16xf32> to vector<16x16xf32>
    %cst_26 = arith.constant dense<0xFF800000> : vector<16xf32>
    %69 = vector.multi_reduction <maximumf>, %68, %cst_26 [1] : vector<16x16xf32> to vector<16xf32>
    %70 = vector.shape_cast %69 : vector<16xf32> to vector<16x1xf32>
    %71 = vector.broadcast %70 : vector<16x1xf32> to vector<16x16xf32>
    %72 = arith.subf %68, %71 : vector<16x16xf32>
    %73 = math.exp %72 : vector<16x16xf32>
    %cst_27 = arith.constant dense<0.000000e+00> : vector<16xf32>
    %74 = vector.multi_reduction <add>, %73, %cst_27 [1] : vector<16x16xf32> to vector<16xf32>
    %75 = vector.shape_cast %74 : vector<16xf32> to vector<16x1xf32>
    %76 = math.log %75 : vector<16x1xf32>
    %77 = arith.addf %76, %70 : vector<16x1xf32>
    %78 = vector.broadcast %c3_i32 : i32 to vector<16x16xi32>
    %79 = arith.cmpi eq, %1, %78 : vector<16x16xi32>
    %80 = vector.broadcast %77 : vector<16x1xf32> to vector<16x16xf32>
    %81 = arith.subf %68, %80 : vector<16x16xf32>
    %cst_28 = arith.constant 0.000000e+00 : f32
    %82 = vector.broadcast %cst_28 : f32 to vector<16x16xf32>
    %83 = arith.select %79, %81, %82 : vector<16x16xi1>, vector<16x16xf32>
    %cst_29 = arith.constant dense<0.000000e+00> : vector<16xf32>
    %84 = vector.multi_reduction <add>, %83, %cst_29 [1] : vector<16x16xf32> to vector<16xf32>
    %85 = vector.shape_cast %84 : vector<16xf32> to vector<16x1xf32>
    %86 = arith.addf %65, %85 : vector<16x1xf32>
    %c4_i32 = arith.constant 4 : i32
    %cst_30 = arith.constant dense<0.000000e+00> : vector<1xf32>
    %87 = vector.multi_reduction <add>, %86, %cst_30 [0] : vector<16x1xf32> to vector<1xf32>
    %88 = vector.shape_cast %87 : vector<1xf32> to vector<1x1xf32>
    %cst_31 = arith.constant 0.000000e+00 : f32
    %89 = vector.broadcast %cst_31 : f32 to vector<1x1xf32>
    %90 = arith.subf %89, %88 : vector<1x1xf32>
    %c0_32 = arith.constant 0 : index
    %c0_33 = arith.constant 0 : index
    %c0_34 = arith.constant 0 : index
    %c0_35 = arith.constant 0 : index
    %91 = vector.load %arg4[%c0_32, %c0_33, %c0_34, %c0_35] : memref<1x1x1x1xf32, #tpu.memory_space<vmem>>, vector<1x1x1x1xf32>
    %92 = vector.shape_cast %91 : vector<1x1x1x1xf32> to vector<1x1xf32>
    %93 = vector.shape_cast %90 : vector<1x1xf32> to vector<1x1x1x1xf32>
    tpu.vector_store %arg4[%c0_32, %c0_33, %c0_34, %c0_35], %93 {strides = array<i32>} : memref<1x1x1x1xf32, #tpu.memory_space<vmem>>, vector<1x1x1x1xf32>,
    return
  }
  func.func @transform_0(%arg0: i32, %arg1: i32) -> (i32, i32, i32, i32) {
    %c0_i32 = arith.constant 0 : i32
    %c0_i32_0 = arith.constant 0 : i32
    %c0_i32_1 = arith.constant 0 : i32
    return %arg0, %c0_i32, %arg1, %c0_i32_0 : i32, i32, i32, i32
  }
  func.func @transform_1(%arg0: i32, %arg1: i32) -> (i32, i32, i32) {
    %c0_i32 = arith.constant 0 : i32
    %c0_i32_0 = arith.constant 0 : i32
    return %arg0, %arg1, %c0_i32 : i32, i32, i32
  }
  func.func @transform_2(%arg0: i32, %arg1: i32) -> (i32, i32, i32, i32) {
    %c0_i32 = arith.constant 0 : i32
    %c0_i32_0 = arith.constant 0 : i32
    %c0_i32_1 = arith.constant 0 : i32
    return %arg0, %arg1, %c0_i32, %c0_i32_0 : i32, i32, i32, i32
  }
}

</mosaic_0001>

<bundles_post_ra>
// kernel: tpu_custom_call.1
= control target key start
LH: loop header
LB: loop body
LE: loop exit
PB: predicated region body
PF: predicated region fallthrough
CT: control target
= control target key end

     0   :  { %7 = vsyncpa [#allocation3], 0  ;;  %s1042_s0 = inlined_call_operand.hbm [shape: f32[2,4,16,16], index: 0, kind: input, shape index: {}]   ;;  %s1043_s1 = inlined_call_operand.hbm [shape: s32[2,16,16], index: 1, kind: input, shape index: {}]   ;;  %s1044_s2 = inlined_call_operand.vmem [shape: f32[2,1,1,1], index: 2, kind: output, shape index: {}]  }
   0x1   :  { %9 = vsyncpa [#allocation3 + $0x1], 0 }
   0x2   :  { %10 = vsyncpa [#allocation5], 0 }
   0x3   :  { %12 = vsyncpa [#allocation5 + $0x1], 0  ;;  %s764_s9 = smov 0   ;;  %s766_s10 = smov 0  }
   0x4   :  { %s768_s11 = smov 0   ;;  %s770_s12 = smov 0  }
   0x5   :  { %s772_s13 = smov 0   ;;  %s774_s14 = smov 0  }
   0x6 LB: > { %s512_s15 = sadd.s32 4294967295, %s743_s14   ;;  %s30_s16 = sadd.s32 1, %s739_s13  ;;  %s743_s14 = sphi %s774_s14, %s18_s14   ;;  %s739_s13 = sphi %s772_s13, %s1055_s13   ;;  %s735_s12 = sphi %s770_s12, %s1054_s12   ;;  %s731_s11 = sphi %s768_s11, %s1053_s11   ;;  %s727_s10 = sphi %s766_s10, %s1052_s10   ;;  %s723_s9 = sphi %s764_s9, %s1051_s9  }
   0x7   : > { %p32_p0 = scmp.ge.s32.totalorder %s30_s16, 2  ;;  %s39_s17 = sadd.s32 1, %s731_s11 }
   0x8   : > { %p46_p1 = scmp.ne.s32.totalorder %s731_s11, %s727_s10  ;;  %p47_p2 = scmp.eq.s32.totalorder %s743_s14, 0 }
   0x9   : > { %s1057_s16 = smov (%p32_p0, %s30_s16), 0  ;;  %p52_p4 = scmp.ne.s32.totalorder %s727_s10, %s723_s9 }
   0xa   : > { %p800_p3 = por %p47_p2, %p46_p1  ;;  %s34_s19 = ssub.s32 %s739_s13, %s1057_s16 }
   0xb   : > { %p53_p5 = scmp.eq.s32.totalorder %s512_s15, 0  ;;  %p37_p6 = scmp.eq.s32.totalorder %s34_s19, 0 }
   0xc   : > { %p546_p8 = scmp.lt.s32.totalorder %s743_s14, 2  ;;  %s816_s22 = sand.u32 1, %s731_s11  }
   0xd   : > { %p807_p7 = por %p53_p5, %p52_p4  ;;  %s533_s23 = sshll.u32 %s739_s13, 10 }
   0xe   : > { %s813_s21 = scalar_select %p37_p6, %s731_s11, %s39_s17  }
   0xf   : > { %s1047_s20 = scalar_select %p807_p7, 1, 0 }
  0x10   : > { %s516_s24 = sshll.u32 %s816_s22, 6  ;;  %s823_s27 = scalar_lea.hbm %s1042_s0, %s533_s23 }
  0x11   : > { %s136_s28 = scalar_lea.vmem [#allocation2], %s516_s24  ;;  %p827_p9 = pnand %p546_p8, %p800_p3 }
  0x12   : > { %s145_s29 = sshll.u32 %s136_s28, 4  ;;  %s133_s3 = scalar_lea.sflag [#allocation3], %s816_s22  ;;  %s831_s29 = int_to_ptr.vmem [resolvable:$true] %s145_s29 }
  0x13   : > { %s629_s4 = scalar_lea.hbm %s823_s27, 1024  ;;  %p631_p11 = pneg %p827_p9 }
  0x14   : > { %p630_p10 = scmp.ne.s32.totalorder %s823_s27, %s629_s4  ;;  %s634_s7 = scalar_lea.hbm %s1042_s0, 2048 }
  0x15   : > { %p635_p0 = scmp.lt.u32.totalorder %s823_s27, %s1042_s0  ;;  %p636_p1 = scmp.lt.u32.totalorder %s634_s7, %s629_s4 }
  0x16   : > { %p632_p12 = pnand %p631_p11, %p630_p10  ;;  %p638_p3 = scmp.lt.u32.totalorder %s629_s4, %s823_s27 }
  0x17   : > { %p637_p2 = por %p636_p1, %p635_p0 }
  0x18   : > { %p633_p13 = pneg %p632_p12 }
  0x19   : > { %p639_p4 = por %p638_p3, %p637_p2 }
  0x1b   : > { %p640_p5 = pnand %p639_p4, %p633_p13 }
  0x1d   : > { %643 = shalt.err (!%p640_p5)
}
  0x1e   : > { %s644_s15 = scalar_lea.vmem %s831_s29, 1024  ;;  %s745_s17 = smov [#allocation2]  }
  0x1f   : > { %p645_p6 = scmp.ne.s32.totalorder %s831_s29, %s644_s15  ;;  %s649_s18 = sshll.u32 %s745_s17, 4  ;;  %s650_s18 = int_to_ptr.vmem [resolvable:$false] %s649_s18 }
  0x20   : > { %s651_s19 = scalar_lea.vmem %s650_s18, 2048  ;;  %p652_p12 = scmp.lt.s32.totalorder %s831_s29, %s650_s18 }
  0x21   : > { %p647_p8 = pnand %p645_p6, %p631_p11  ;;  %p653_p0 = scmp.lt.s32.totalorder %s651_s19, %s644_s15 }
  0x23   : > { %p648_p10 = pneg %p647_p8  ;;  %p654_p1 = por %p653_p0, %p652_p12 }
  0x25   : > { %p655_p2 = pnand %p654_p1, %p648_p10 }
  0x27   : > { %658 = shalt.err (!%p655_p2)
}
  0x28   : > { %s746_s23 = smov 128   ;;  %s747_s24 = smov 8  }
  0x29   : > { %542 = dma.hbm_to_vmem [thread:$0]  (!%p827_p9), %s823_s27, 1024, %s831_s29, %s133_s3, %s746_s23, %s746_s23, %s747_s24  }
  0x2a   : > { %p522_p13 = scmp.ge.s32.totalorder %s743_s14, 1  ;;  %p176_p3 = scmp.lt.s32.totalorder %s743_s14, 3 }
  0x2b   : > { %s519_s25 = sshll.u32 %s816_s22, 4  ;;  %s534_s28 = sshll.u32 %s739_s13, 8 }
  0x2c   : > { %p867_p4 = pnand %p522_p13, %p176_p3  ;;  %s159_s4 = scalar_lea.vmem [#allocation4], %s519_s25 }
  0x2d   : > { %s168_s5 = sshll.u32 %s159_s4, 4  ;;  %s875_s8 = scalar_lea.hbm %s1043_s1, %s534_s28  ;;  %s877_s5 = int_to_ptr.vmem [resolvable:$true] %s168_s5 }
  0x2e   : > { %s156_s27 = scalar_lea.sflag [#allocation5], %s816_s22  ;;  %s659_s29 = scalar_lea.hbm %s875_s8, 256 }
  0x2f   : > { %p660_p5 = scmp.ne.s32.totalorder %s875_s8, %s659_s29  ;;  %s664_s15 = scalar_lea.hbm %s1043_s1, 512 }
  0x30   : > { %p665_p10 = scmp.lt.u32.totalorder %s875_s8, %s1043_s1  ;;  %p666_p12 = scmp.lt.u32.totalorder %s664_s15, %s659_s29 }
  0x31   : > { %p662_p6 = pnand %p660_p5, %p631_p11  ;;  %p668_p1 = scmp.lt.u32.totalorder %s659_s29, %s875_s8 }
  0x32   : > { %p667_p0 = por %p666_p12, %p665_p10 }
  0x33   : > { %p663_p8 = pneg %p662_p6 }
  0x34   : > { %p669_p2 = por %p668_p1, %p667_p0 }
  0x36   : > { %p670_p13 = pnand %p669_p2, %p663_p8 }
  0x38   : > { %673 = shalt.err (!%p670_p13)
}
  0x39   : > { %s674_s19 = scalar_lea.vmem %s877_s5, 256  ;;  %s748_s25 = smov [#allocation4]  }
  0x3a   : > { %p675_p3 = scmp.ne.s32.totalorder %s877_s5, %s674_s19  ;;  %s679_s28 = sshll.u32 %s748_s25, 4  ;;  %s680_s28 = int_to_ptr.vmem [resolvable:$false] %s679_s28 }
  0x3b   : > { %s681_s4 = scalar_lea.vmem %s680_s28, 512  ;;  %p682_p7 = scmp.lt.s32.totalorder %s877_s5, %s680_s28 }
  0x3c   : > { %p677_p5 = pnand %p675_p3, %p631_p11  ;;  %p683_p10 = scmp.lt.s32.totalorder %s681_s4, %s674_s19 }
  0x3e   : > { %p678_p6 = pneg %p677_p5  ;;  %p684_p12 = por %p683_p10, %p682_p7 }
  0x40   : > { %p685_p0 = pnand %p684_p12, %p678_p6 }
  0x42   : > { %688 = shalt.err (!%p685_p0)
}
  0x43   : > { %545 = dma.hbm_to_vmem [thread:$0]  (!%p827_p9), %s875_s8, 256, %s877_s5, %s156_s27, %s746_s23, %s746_s23, %s747_s24  }
  0x44   : > { %180 = sbr.rel (%p867_p4) target bundleno = 577 (0x241), region = 28  ;;  %s182_s6 = sand.u32 (!%p867_p4), 1, %s727_s10  }
  0x45   : > { %s523_s7 = sshll.u32 (!%p867_p4), %s182_s6, 6  ;;  %s183_s29 = scalar_lea.sflag (!%p867_p4), [#allocation3], %s182_s6 }
  0x46   : > { %s186_s3 = scalar_lea.vmem (!%p867_p4), [#allocation2], %s523_s7  ;;  %p1050_p7 = scmp.ne.s32.totalorder (!%p867_p4), %s1047_s20, 0 }
  0x4b   : > { %714 = dma.done.wait (%p1050_p7), %s183_s29, 1024  }
  0x4c   : > { %716 = vsyncadd (%p1050_p7), %s183_s29, 4294966272  ;;  %s524_s30 = sshll.u32 %s182_s6, 4  ;;  %s192_s22 = scalar_lea.sflag [#allocation5], %s182_s6 }
  0x4d   : > { %s915_s9 = scalar_lea.vmem [#allocation4], %s524_s30 }
  0x4e   : > { %718 = dma.done.wait (%p1050_p7), %s192_s22, 256  }
  0x4f   : > { %720 = vsyncadd (%p1050_p7), %s192_s22, 4294967040  ;;  %vm234_vm0 = vcmask 130048   ;;  %v921_v0 = vld [vmem:[%s186_s3] sm:$0xff]  ;;  %v923_v1 = vld [vmem:[%s186_s3 + $0x10] sm:$0xff]  ;;  %p224_p9 = scmp.lt.s32.totalorder %s735_s12, 1  ;;  %vm404_vm9 = vcmask 0  }
  0x50   : > { %v925_v2 = vld [vmem:[%s186_s3 + $0x8] sm:$0xff]  ;;  %v235_v3 = vsel %vm234_vm0, %v921_v0, -inf  ;;  %v276_v4 = vsel %vm234_vm0, %v923_v1, -inf  ;;  %v931_v5 = vld [vmem:[%s186_s3 + $0x18] sm:$0xff]  ;;  %v937_v8 = vld [vmem:[%s186_s3 + $0x20] sm:$0xff] }
  0x51   : > { %236 = vmax.xlane.f32.xlu0 %v235_v3  ;;  %277 = vmax.xlane.f32.xlu1 %v276_v4  ;;  %v238_v6 = vsel %vm234_vm0, %v925_v2, -inf  ;;  %v279_v7 = vsel %vm234_vm0, %v931_v5, -inf  ;;  %v939_v9 = vld [vmem:[%s186_s3 + $0x28] sm:$0xff]  ;;  %v317_v10 = vsel %vm234_vm0, %v937_v8, -inf  ;;  %v945_v12 = vld [vmem:[%s186_s3 + $0x30] sm:$0xff]  ;;  %v947_v13 = vld [vmem:[%s186_s3 + $0x38] sm:$0xff] }
  0x52   : > { %v320_v11 = vsel %vm234_vm0, %v939_v9, -inf  ;;  %v358_v14 = vsel %vm234_vm0, %v945_v12, -inf  ;;  %v361_v15 = vsel %vm234_vm0, %v947_v13, -inf  ;;  %v230_v4 = vld [vmem:[%s915_s9] sm:$0xff]  ;;  %s1059_s12 = smov (!%p224_p9, %s735_s12), 1 }
  0x53   : > { %vm259_vm1 = vcmp.eq.s32.totalorder %v230_v4, 0  ;;  %vm300_vm3 = vcmp.eq.s32.totalorder %v230_v4, 1  ;;  %vm341_vm5 = vcmp.eq.s32.totalorder %v230_v4, 2  ;;  %vm382_vm7 = vcmp.eq.s32.totalorder %v230_v4, 3  ;;  %s229_s24 = scalar_lea.vmem %s1044_s2, %s1059_s12 }
  0x55   : > { %239 = vmax.xlane.f32.xlu0 %v238_v6  ;;  %280 = vmax.xlane.f32.xlu1 %v279_v7 }
  0x59   : > { %318 = vmax.xlane.f32.xlu0 %v317_v10  ;;  %321 = vmax.xlane.f32.xlu1 %v320_v11 }
  0x5d   : > { %359 = vmax.xlane.f32.xlu0 %v358_v14  ;;  %362 = vmax.xlane.f32.xlu1 %v361_v15 }
  0xde   : > { %v953_v16 = vpop.xlane.xlu0 %236  ;;  %v955_v17 = vpop.xlane.xlu1 %277 }
  0xdf   : > { %v241_v18 = vsub.f32 %v921_v0, %v953_v16  ;;  %v282_v19 = vsub.f32 %v923_v1, %v955_v17 }
  0xe1   : > { %v243_v20 = vmul.f32 1.442695, %v241_v18  ;;  %v284_v21 = vmul.f32 1.442695, %v282_v19  ;;  %v231_v18 = vld [vmem:[%s915_s9 + $0x8] sm:$0xff] }
  0xe2   : > { %v961_v22 = vpop.xlane.xlu0 %239  ;;  %v963_v23 = vpop.xlane.xlu1 %280  ;;  %vm260_vm2 = vcmp.eq.s32.totalorder %v231_v18, 0  ;;  %vm301_vm4 = vcmp.eq.s32.totalorder %v231_v18, 1  ;;  %vm342_vm6 = vcmp.eq.s32.totalorder %v231_v18, 2  ;;  %vm383_vm8 = vcmp.eq.s32.totalorder %v231_v18, 3 }
  0xe3   : > { %597 = vpow2.f32 %v243_v20  ;;  %v242_v24 = vsub.f32 %v925_v2, %v961_v22  ;;  %v283_v25 = vsub.f32 %v931_v5, %v963_v23 }
  0xe4   : > { %599 = vpow2.f32 %v284_v21 }
  0xe5   : > { %v245_v26 = vmul.f32 1.442695, %v242_v24  ;;  %v286_v27 = vmul.f32 1.442695, %v283_v25 }
  0xe6   : > { %v969_v28 = vpop.xlane.xlu0 %318  ;;  %v971_v29 = vpop.xlane.xlu1 %321 }
  0xe7   : > { %601 = vpow2.f32 %v245_v26  ;;  %v323_v30 = vsub.f32 %v937_v8, %v969_v28  ;;  %v324_v31 = vsub.f32 %v939_v9, %v971_v29 }
  0xe8   : > { %603 = vpow2.f32 %v286_v27 }
  0xe9   : > { %v325_v32 = vmul.f32 1.442695, %v323_v30  ;;  %v327_v33 = vmul.f32 1.442695, %v324_v31 }
  0xea   : > { %v977_v34 = vpop.xlane.xlu0 %359  ;;  %v979_v35 = vpop.xlane.xlu1 %362 }
  0xeb   : > { %605 = vpow2.f32 %v325_v32  ;;  %v364_v36 = vsub.f32 %v945_v12, %v977_v34  ;;  %v365_v37 = vsub.f32 %v947_v13, %v979_v35 }
  0xec   : > { %607 = vpow2.f32 %v327_v33 }
  0xed   : > { %v598_v38 = vpop.eup %597  ;;  %v366_v39 = vmul.f32 1.442695, %v364_v36  ;;  %v368_v40 = vmul.f32 1.442695, %v365_v37 }
  0xee   : > { %v600_v41 = vpop.eup %599  ;;  %v247_v42 = vsel %vm234_vm0, %v598_v38, 0.0 }
  0xef   : > { %609 = vpow2.f32 %v366_v39  ;;  %248 = vadd.xlane.f32.xlu0 %v247_v42  ;;  %v288_v43 = vsel %vm234_vm0, %v600_v41, 0.0 }
  0xf0   : > { %611 = vpow2.f32 %v368_v40 }
  0xf1   : > { %v602_v44 = vpop.eup %601 }
  0xf2   : > { %v604_v45 = vpop.eup %603  ;;  %v250_v46 = vsel %vm234_vm0, %v602_v44, 0.0 }
  0xf3   : > { %289 = vadd.xlane.f32.xlu0 %v288_v43  ;;  %251 = vadd.xlane.f32.xlu1 %v250_v46  ;;  %v291_v47 = vsel %vm234_vm0, %v604_v45, 0.0 }
  0xf5   : > { %v606_v48 = vpop.eup %605 }
  0xf6   : > { %v608_v49 = vpop.eup %607  ;;  %v329_v50 = vsel %vm234_vm0, %v606_v48, 0.0 }
  0xf7   : > { %292 = vadd.xlane.f32.xlu1 %v291_v47  ;;  %330 = vadd.xlane.f32.xlu0 %v329_v50  ;;  %v332_v51 = vsel %vm234_vm0, %v608_v49, 0.0 }
  0xf9   : > { %v610_v52 = vpop.eup %609 }
  0xfa   : > { %v612_v53 = vpop.eup %611  ;;  %v370_v54 = vsel %vm234_vm0, %v610_v52, 0.0 }
  0xfb   : > { %333 = vadd.xlane.f32.xlu1 %v332_v51  ;;  %371 = vadd.xlane.f32.xlu0 %v370_v54  ;;  %v373_v55 = vsel %vm234_vm0, %v612_v53, 0.0 }
  0xff   : > { %374 = vadd.xlane.f32.xlu1 %v373_v55 }
 0x17c   : > { %v249_v56 = vpop.xlane.xlu0 %248 }
 0x17d   : > { %613 = vlog2.f32 %v249_v56 }
 0x180   : > { %v252_v57 = vpop.xlane.xlu1 %251  ;;  %v290_v58 = vpop.xlane.xlu0 %289 }
 0x181   : > { %615 = vlog2.f32 %v252_v57 }
 0x182   : > { %617 = vlog2.f32 %v290_v58 }
 0x184   : > { %v293_v59 = vpop.xlane.xlu1 %292  ;;  %v331_v60 = vpop.xlane.xlu0 %330 }
 0x185   : > { %619 = vlog2.f32 %v293_v59 }
 0x186   : > { %621 = vlog2.f32 %v331_v60 }
 0x187   : > { %v614_v61 = vpop.eup %613 }
 0x188   : > { %v254_v62 = vmul.f32 0.6931472, %v614_v61  ;;  %v334_v63 = vpop.xlane.xlu1 %333  ;;  %v372_v3 = vpop.xlane.xlu0 %371 }
 0x189   : > { %623 = vlog2.f32 %v334_v63 }
 0x18a   : > { %v257_v6 = vadd.f32 %v254_v62, %v953_v16  ;;  %625 = vlog2.f32 %v372_v3 }
 0x18b   : > { %v616_v7 = vpop.eup %615 }
 0x18c   : > { %v618_v10 = vpop.eup %617  ;;  %v256_v11 = vmul.f32 0.6931472, %v616_v7  ;;  %v375_v14 = vpop.xlane.xlu1 %374  ;;  %v261_v15 = vsub.f32 %v921_v0, %v257_v6 }
 0x18d   : > { %v295_v19 = vmul.f32 0.6931472, %v618_v10  ;;  %627 = vlog2.f32 %v375_v14 }
 0x18e   : > { %v258_v20 = vadd.f32 %v256_v11, %v961_v22  ;;  %v263_v21 = vsel %vm259_vm1, %v261_v15, 0.0 }
 0x18f   : > { %v620_v24 = vpop.eup %619  ;;  %v298_v25 = vadd.f32 %v295_v19, %v955_v17  ;;  %v265_v26 = vsel %vm234_vm0, %v263_v21, 0.0 }
 0x190   : > { %v622_v16 = vpop.eup %621  ;;  %v297_v27 = vmul.f32 0.6931472, %v620_v24  ;;  %266 = vadd.xlane.f32.xlu0 %v265_v26  ;;  %v262_v30 = vsub.f32 %v925_v2, %v258_v20 }
 0x191   : > { %v336_v31 = vmul.f32 0.6931472, %v622_v16  ;;  %v302_v0 = vsub.f32 %v923_v1, %v298_v25 }
 0x192   : > { %v299_v32 = vadd.f32 %v297_v27, %v963_v23  ;;  %v264_v33 = vsel %vm260_vm2, %v262_v30, 0.0 }
 0x193   : > { %v624_v22 = vpop.eup %623  ;;  %v339_v36 = vadd.f32 %v336_v31, %v969_v28  ;;  %v268_v17 = vsel %vm234_vm0, %v264_v33, 0.0  ;;  %v304_v37 = vsel %vm300_vm3, %v302_v0, 0.0 }
 0x194   : > { %v626_v38 = vpop.eup %625  ;;  %v338_v39 = vmul.f32 0.6931472, %v624_v22  ;;  %269 = vadd.xlane.f32.xlu1 %v268_v17  ;;  %v306_v40 = vsel %vm234_vm0, %v304_v37, 0.0  ;;  %v303_v2 = vsub.f32 %v931_v5, %v299_v32 }
 0x195   : > { %v377_v41 = vmul.f32 0.6931472, %v626_v38  ;;  %307 = vadd.xlane.f32.xlu0 %v306_v40  ;;  %v343_v1 = vsub.f32 %v937_v8, %v339_v36 }
 0x196   : > { %v340_v23 = vadd.f32 %v338_v39, %v971_v29  ;;  %v305_v42 = vsel %vm301_vm4, %v303_v2, 0.0 }
 0x197   : > { %v628_v28 = vpop.eup %627  ;;  %v380_v43 = vadd.f32 %v377_v41, %v977_v34  ;;  %v309_v44 = vsel %vm234_vm0, %v305_v42, 0.0  ;;  %v345_v45 = vsel %vm341_vm5, %v343_v1, 0.0 }
 0x198   : > { %v379_v46 = vmul.f32 0.6931472, %v628_v28  ;;  %310 = vadd.xlane.f32.xlu1 %v309_v44  ;;  %v347_v47 = vsel %vm234_vm0, %v345_v45, 0.0  ;;  %v344_v5 = vsub.f32 %v939_v9, %v340_v23 }
 0x199   : > { %348 = vadd.xlane.f32.xlu0 %v347_v47  ;;  %v384_v8 = vsub.f32 %v945_v12, %v380_v43 }
 0x19a   : > { %v381_v29 = vadd.f32 %v379_v46, %v979_v35  ;;  %v346_v48 = vsel %vm342_vm6, %v344_v5, 0.0 }
 0x19b   : > { %v350_v49 = vsel %vm234_vm0, %v346_v48, 0.0  ;;  %v386_v34 = vsel %vm382_vm7, %v384_v8, 0.0 }
 0x19c   : > { %351 = vadd.xlane.f32.xlu1 %v350_v49  ;;  %v388_v50 = vsel %vm234_vm0, %v386_v34, 0.0  ;;  %v385_v51 = vsub.f32 %v947_v13, %v381_v29 }
 0x19d   : > { %389 = vadd.xlane.f32.xlu0 %v388_v50 }
 0x19e   : > { %v387_v52 = vsel %vm383_vm8, %v385_v51, 0.0 }
 0x19f   : > { %v391_v9 = vsel %vm234_vm0, %v387_v52, 0.0 }
 0x1a0   : > { %392 = vadd.xlane.f32.xlu1 %v391_v9 }
 0x21d   : > { %v267_v53 = vpop.xlane.xlu0 %266 }
 0x221   : > { %v270_v54 = vpop.xlane.xlu1 %269 }
 0x222   : > { %v308_v12 = vpop.xlane.xlu0 %307 }
 0x223   : > { %v312_v57 = vadd.f32 %v308_v12, %v267_v53 }
 0x225   : > { %v311_v35 = vpop.xlane.xlu1 %310 }
 0x226   : > { %v349_v55 = vpop.xlane.xlu0 %348  ;;  %v313_v58 = vadd.f32 %v311_v35, %v270_v54 }
 0x227   : > { %v353_v60 = vadd.f32 %v349_v55, %v312_v57 }
 0x229   : > { %v352_v56 = vpop.xlane.xlu1 %351 }
 0x22a   : > { %v390_v59 = vpop.xlane.xlu0 %389  ;;  %v354_v61 = vadd.f32 %v352_v56, %v313_v58 }
 0x22b   : > { %v394_v13 = vadd.f32 %v390_v59, %v353_v60 }
 0x22d   : > { %v393_v62 = vpop.xlane.xlu1 %392 }
 0x22e   : > { %v395_v63 = vadd.f32 %v393_v62, %v354_v61 }
 0x230   : > { %v396_v3 = vadd.f32 %v395_v63, %v394_v13 }
 0x232   : > { %v397_v4 = vrot.slane %v396_v3, 4 }
 0x234   : > { %v398_v6 = vadd.f32 %v397_v4, %v396_v3 }
 0x236   : > { %v399_v7 = vrot.slane %v398_v6, 2 }
 0x238   : > { %v400_v10 = vadd.f32 %v399_v7, %v398_v6 }
 0x23a   : > { %v401_v11 = vrot.slane %v400_v10, 1 }
 0x23c   : > { %v402_v14 = vadd.f32 %v401_v11, %v400_v10 }
 0x23e   : > { %v403_v15 = vsub.f32 0.0, %v402_v14 }
 0x240   : > { %405 = vst.msk [vmem:[%s229_s24] sm:$0x1] %vm404_vm9, %v403_v15 }
 0x241 PF: > { %s18_s14 = sadd.s32 1, %s743_s14   ;;  %s1051_s9 = smov %s727_s10 }
 0x242   : > { %p15_p11 = scmp.ge.s32.totalorder %s18_s14, 4   ;;  %s1052_s10 = smov %s731_s11 }
 0x243   : > { %s1053_s11 = smov %s813_s21  ;;  %s1054_s12 = smov %s739_s13 }
 0x244   : > { %s1055_s13 = smov %s1057_s16  ;;  %17 = sbr.rel (!%p15_p11) target bundleno = 6 (0x6), region = 84 }
 0x24b   :  { %429 = vsyncpa [#allocation3], 1 }
 0x24c   :  { %431 = vsyncpa [#allocation3 + $0x1], 1 }
 0x24d   :  { %432 = vsyncpa [#allocation5], 1 }
 0x24e   :  { %434 = vsyncpa [#allocation5 + $0x1], 1 }

</bundles_post_ra>
